<compile_context>
chip_gen: v6e
topology: v6e:2x2x1
jax: 0.10.0
libtpu: 0.0.40
codegen_flags: <defaults>
</compile_context>

<pallas_src>
import jax
import jax.numpy as jnp
from jax import lax
from jax.experimental import pallas as pl
from jax.experimental.pallas import tpu as pltpu

EPS = 1e-5


# ---------------------------------------------------------------------------
# Pass 1: per-image partial Gram matrix and channel sums of the input.
# Refs (leading image dim squeezed away by the BlockSpec):
#   x_ref : (C, T)  one channels-first pixel tile of one image
#   g_ref : (C, C)  partial Gram accumulator for this image
#   sx_ref: (C, 1)  partial channel-sum accumulator for this image
# ---------------------------------------------------------------------------
def _stats_kernel(x_ref, g_ref, sx_ref):
    @pl.when(pl.program_id(1) == 0)          # first pixel tile of this image
    def _():
        g_ref[...] = jnp.zeros_like(g_ref)
        sx_ref[...] = jnp.zeros_like(sx_ref)

    x = x_ref[...]                                             # (C, T) f32
    g_ref[...] += lax.dot_general(                             # x @ x^T on MXU
        x, x, (((1,), (1,)), ((), ())),
        preferred_element_type=jnp.float32)
    sx_ref[...] += jnp.sum(x, axis=1, keepdims=True)           # lane reduce (XLU)


# ---------------------------------------------------------------------------
# Pass 2: per-tile  out = relu(Aeff @ x + beff) + x  (single fused matmul+FMA).
# ---------------------------------------------------------------------------
def _apply_kernel(x_ref, a_ref, b_ref, o_ref):
    x = x_ref[...]                                             # (C, T)
    z = jnp.dot(a_ref[...], x, preferred_element_type=jnp.float32)
    z = z + b_ref[...]                                         # (C,1) bcast over lanes
    o_ref[...] = (jnp.maximum(z, 0.0) + x).astype(o_ref.dtype)


def _pick_hw_tile(hw):
    """Largest lane-friendly pixel tile (multiple of 128) that divides H*W."""
    for t in (2048, 1024, 512, 256, 128):
        if hw % t == 0:
            return t
    return hw  # fall back to the full spatial extent


def gtnet_resblock(x_nchw, params):
    """Forward pass of GTNet_resblock (training-mode BatchNorm) on TPU."""
    N, C, H, W = x_nchw.shape
    HW = H * W
    P = N * HW                              # rows BN statistics average over
    T = _pick_hw_tile(HW)
    n_hw = HW // T

    # Free view: NCHW -> (N, C, H*W).  Data never leaves channels-first layout.
    x3 = x_nchw.reshape(N, C, HW)

    tile_spec = pl.BlockSpec((pl.Squeezed(), C, T), lambda n, p: (n, 0, p))

    # ---- pass 1: global input statistics (Gram + channel sums) -------------
    g_part, sx_part = pl.pallas_call(
        _stats_kernel,
        out_shape=(jax.ShapeDtypeStruct((N, C, C), jnp.float32),
                   jax.ShapeDtypeStruct((N, C, 1), jnp.float32)),
        grid=(N, n_hw),
        in_specs=[tile_spec],
        out_specs=(pl.BlockSpec((pl.Squeezed(), C, C), lambda n, p: (n, 0, 0)),
                   pl.BlockSpec((pl.Squeezed(), C, 1), lambda n, p: (n, 0, 0))),
        compiler_params=pltpu.CompilerParams(
            dimension_semantics=("parallel", "arbitrary")),
    )(x3)
    gram = jnp.sum(g_part, axis=0)          # (C, C) combine per-image partials
    sumx = jnp.sum(sx_part, axis=0)         # (C, 1)

    # ---- fold conv+BN chain into one affine map (tiny, pixel-independent) --
    w1, g1, b1 = params["w1"], params["g1"], params["b1"]
    w2, g2, b2 = params["w2"], params["g2"], params["b2"]
    w3, g3, b3 = params["w3"], params["g3"], params["b3"]
    pf = jnp.float32(P)

    def bn_affine(A, c, gamma, beta):
        # Layer output is H = A @ X + c (per out-channel row).  Its global
        # batch mean / biased variance follow exactly from gram and sumx:
        #   sum(H)_j  = A_j. @ sumx + P*c_j
        #   sum(H^2)_j = A_j. G A_j.^T + 2 c_j (A_j. @ sumx) + P c_j^2
        asx = A @ sumx                                          # (out, 1)
        mean = (asx + pf * c) / pf
        e2 = (jnp.sum((A @ gram) * A, axis=1, keepdims=True)
              + 2.0 * c * asx + pf * c * c) / pf
        var = jnp.maximum(e2 - mean * mean, 0.0)
        scale = gamma * lax.rsqrt(var + EPS)        # BN(y) = scale*y + shift
        shift = beta - mean * scale
        return scale, shift

    s1, t1 = bn_affine(w1, jnp.zeros_like(b1), g1, b1)   # BN1 of h1 = W1 @ X
    A2 = (w2 * s1.T) @ w1                                # W2 diag(s1) W1  (hid, C)
    c2 = w2 @ t1                                         #                 (hid, 1)
    s2, t2 = bn_affine(A2, c2, g2, b2)                   # BN2 of h2 = A2 @ X + c2
    A3 = (w3 * s2.T) @ A2                                # W3 diag(s2) A2  (C, C)
    c3 = w3 @ (s2 * c2 + t2)                             #                 (C, 1)
    s3, t3 = bn_affine(A3, c3, g3, b3)                   # BN3 of h3 = A3 @ X + c3
    a_eff = s3 * A3                                      # diag(s3) A3     (C, C)
    b_eff = s3 * c3 + t3                                 #                 (C, 1)

    # ---- pass 2: per-tile relu(Aeff @ x + beff) + x -------------------------
    # TODO(synk): optionally cast a_eff / x tiles to bf16 for the MXU (keep f32
    # accumulation) on v6e/v7x if the accuracy budget allows; kept f32 here.
    out3 = pl.pallas_call(
        _apply_kernel,
        out_shape=jax.ShapeDtypeStruct((N, C, HW), x_nchw.dtype),
        grid=(N, n_hw),
        in_specs=[tile_spec,
                  pl.BlockSpec((C, C), lambda n, p: (0, 0)),   # VMEM-resident
                  pl.BlockSpec((C, 1), lambda n, p: (0, 0))],  # VMEM-resident
        out_specs=tile_spec,
        compiler_params=pltpu.CompilerParams(
            dimension_semantics=("parallel", "parallel")),
    )(x3, a_eff, b_eff)

    return out3.reshape(N, C, H, W)


# ---------------------------------------------------------------------------
# Parameters / reference
# ---------------------------------------------------------------------------
def init_params(key, in_out_dim, hid_dim):
    """Synthetic params with PyTorch shapes: Conv2d weight (out, in, 1, 1)
    stored as (out, in); BN gamma/beta stored as (dim, 1) channel columns."""
    ks = jax.random.split(key, 9)

    def conv_w(k, out_c, in_c):
        bound = 1.0 / jnp.sqrt(jnp.float32(in_c))
        return jax.random.uniform(k, (out_c, in_c), jnp.float32, -bound, bound)

    def bn_gb(kg, kb, dim):
        gamma = 1.0 + 0.1 * jax.random.normal(kg, (dim, 1), jnp.float32)
        beta = 0.1 * jax.random.normal(kb, (dim, 1), jnp.float32)
        return gamma, beta

    g1, b1 = bn_gb(ks[1], ks[2], hid_dim)
    g2, b2 = bn_gb(ks[4], ks[5], hid_dim)
    g3, b3 = bn_gb(ks[7], ks[8], in_out_dim)
    return {
        "w1": conv_w(ks[0], hid_dim, in_out_dim), "g1": g1, "b1": b1,
        "w2": conv_w(ks[3], hid_dim, hid_dim),    "g2": g2, "b2": b2,
        "w3": conv_w(ks[6], in_out_dim, hid_dim), "g3": g3, "b3": b3,
    }


def reference(x_nchw, params):
    """Straightforward JAX port of the PyTorch forward (training-mode BN)."""
    N, C, H, W = x_nchw.shape
    x2d = jnp.transpose(x_nchw, (0, 2, 3, 1)).reshape(N * H * W, C)

    def bn(y, gamma, beta):
        mean = jnp.mean(y, axis=0, keepdims=True)
        var = jnp.mean((y - mean) ** 2, axis=0, keepdims=True)
        return (y - mean) * lax.rsqrt(var + EPS) * gamma + beta

    h = bn(x2d @ params["w1"].T, params["g1"].T, params["b1"].T)
    h = bn(h @ params["w2"].T, params["g2"].T, params["b2"].T)
    h = bn(h @ params["w3"].T, params["g3"].T, params["b3"].T)
    out2d = jnp.maximum(h, 0.0) + x2d
    return jnp.transpose(out2d.reshape(N, H, W, C), (0, 3, 1, 2))


if __name__ == "__main__":
    # Scaled-down shapes consistent with the module (in_out_dim->128, hid->64).
    N, C_IN, C_HID, H, W = 2, 128, 64, 16, 16

    key = jax.random.PRNGKey(0)
    kx, kp = jax.random.split(key)
    x = jax.random.normal(kx, (N, C_IN, H, W), jnp.float32)
    params = init_params(kp, C_IN, C_HID)

    fwd = jax.jit(gtnet_resblock)
    out = jax.block_until_ready(fwd(x, params))
    ref = jax.block_until_ready(reference(x, params))

    assert out.shape == x.shape
    assert jnp.allclose(out, ref, atol=5e-4, rtol=5e-4), \
        float(jnp.max(jnp.abs(out - ref)))
    print("KERNEL_OK")
</pallas_src>

<mosaic_0001>
module attributes {stable_mosaic.version = 11 : i64} {
  func.func @_stats_kernel(%arg0: i32, %arg1: i32, %arg2: memref<1x128x256xf32, #tpu.memory_space<vmem>>, %arg3: memref<1x128x128xf32, #tpu.memory_space<vmem>>, %arg4: memref<1x128x1xf32, #tpu.memory_space<vmem>>) attributes {dimension_semantics = [#tpu.dimension_semantics<parallel>, #tpu.dimension_semantics<arbitrary>], iteration_bounds = array<i64: 2, 1>, scalar_prefetch = 0 : i64, scratch_operands = 0 : i64, tpu.core_type = #tpu.core_type<tc>, window_params = [{transform_indices = @transform_0, window_bounds = array<i64: 1, 128, 256>}, {transform_indices = @transform_1, window_bounds = array<i64: 1, 128, 128>}, {transform_indices = @transform_2, window_bounds = array<i64: 1, 128, 1>}]} {
    %c0_i32 = arith.constant 0 : i32
    %0 = arith.cmpi eq, %arg1, %c0_i32 : i32
    %1 = arith.extui %0 : i1 to i32
    %c0_i32_0 = arith.constant 0 : i32
    %2 = arith.cmpi ne, %1, %c0_i32_0 : i32
    scf.if %2 {
      %cst_16 = arith.constant 0.000000e+00 : f32
      %20 = vector.broadcast %cst_16 : f32 to vector<128x128xf32>
      %c0_17 = arith.constant 0 : index
      %c0_18 = arith.constant 0 : index
      %c0_19 = arith.constant 0 : index
      %21 = vector.load %arg3[%c0_17, %c0_18, %c0_19] : memref<1x128x128xf32, #tpu.memory_space<vmem>>, vector<1x128x128xf32>
      %22 = vector.shape_cast %21 : vector<1x128x128xf32> to vector<128x128xf32>
      %23 = vector.shape_cast %20 : vector<128x128xf32> to vector<1x128x128xf32>
      tpu.vector_store %arg3[%c0_17, %c0_18, %c0_19], %23 {strides = array<i32>} : memref<1x128x128xf32, #tpu.memory_space<vmem>>, vector<1x128x128xf32>,
      %cst_20 = arith.constant 0.000000e+00 : f32
      %24 = vector.broadcast %cst_20 : f32 to vector<128x1xf32>
      %c0_21 = arith.constant 0 : index
      %c0_22 = arith.constant 0 : index
      %c0_23 = arith.constant 0 : index
      %25 = vector.load %arg4[%c0_21, %c0_22, %c0_23] : memref<1x128x1xf32, #tpu.memory_space<vmem>>, vector<1x128x1xf32>
      %26 = vector.shape_cast %25 : vector<1x128x1xf32> to vector<128x1xf32>
      %27 = vector.shape_cast %24 : vector<128x1xf32> to vector<1x128x1xf32>
      tpu.vector_store %arg4[%c0_21, %c0_22, %c0_23], %27 {strides = array<i32>} : memref<1x128x1xf32, #tpu.memory_space<vmem>>, vector<1x128x1xf32>,
    } else {
    }
    %c0 = arith.constant 0 : index
    %c0_1 = arith.constant 0 : index
    %c0_2 = arith.constant 0 : index
    %3 = vector.load %arg2[%c0, %c0_1, %c0_2] : memref<1x128x256xf32, #tpu.memory_space<vmem>>, vector<1x128x256xf32>
    %4 = vector.shape_cast %3 : vector<1x128x256xf32> to vector<128x256xf32>
    %c0_3 = arith.constant 0 : index
    %c0_4 = arith.constant 0 : index
    %c0_5 = arith.constant 0 : index
    %5 = vector.load %arg3[%c0_3, %c0_4, %c0_5] : memref<1x128x128xf32, #tpu.memory_space<vmem>>, vector<1x128x128xf32>
    %6 = vector.shape_cast %5 : vector<1x128x128xf32> to vector<128x128xf32>
    %cst = arith.constant dense<0.000000e+00> : vector<128x128xf32>
    %7 = tpu.matmul %4, %4, %cst {dimension_numbers = #tpu.dot_dimension_numbers<[1], [1], [0], [0], [0, 0, 1, 0], [], []>} : vector<128x256xf32>, vector<128x256xf32>, vector<128x128xf32> -> vector<128x128xf32>
    %8 = arith.addf %6, %7 : vector<128x128xf32>
    %c0_6 = arith.constant 0 : index
    %c0_7 = arith.constant 0 : index
    %c0_8 = arith.constant 0 : index
    %9 = vector.load %arg3[%c0_6, %c0_7, %c0_8] : memref<1x128x128xf32, #tpu.memory_space<vmem>>, vector<1x128x128xf32>
    %10 = vector.shape_cast %9 : vector<1x128x128xf32> to vector<128x128xf32>
    %11 = vector.shape_cast %8 : vector<128x128xf32> to vector<1x128x128xf32>
    tpu.vector_store %arg3[%c0_6, %c0_7, %c0_8], %11 {strides = array<i32>} : memref<1x128x128xf32, #tpu.memory_space<vmem>>, vector<1x128x128xf32>,
    %c0_9 = arith.constant 0 : index
    %c0_10 = arith.constant 0 : index
    %c0_11 = arith.constant 0 : index
    %12 = vector.load %arg4[%c0_9, %c0_10, %c0_11] : memref<1x128x1xf32, #tpu.memory_space<vmem>>, vector<1x128x1xf32>
    %13 = vector.shape_cast %12 : vector<1x128x1xf32> to vector<128x1xf32>
    %cst_12 = arith.constant dense<0.000000e+00> : vector<128xf32>
    %14 = vector.multi_reduction <add>, %4, %cst_12 [1] : vector<128x256xf32> to vector<128xf32>
    %15 = vector.shape_cast %14 : vector<128xf32> to vector<128x1xf32>
    %16 = arith.addf %13, %15 : vector<128x1xf32>
    %c0_13 = arith.constant 0 : index
    %c0_14 = arith.constant 0 : index
    %c0_15 = arith.constant 0 : index
    %17 = vector.load %arg4[%c0_13, %c0_14, %c0_15] : memref<1x128x1xf32, #tpu.memory_space<vmem>>, vector<1x128x1xf32>
    %18 = vector.shape_cast %17 : vector<1x128x1xf32> to vector<128x1xf32>
    %19 = vector.shape_cast %16 : vector<128x1xf32> to vector<1x128x1xf32>
    tpu.vector_store %arg4[%c0_13, %c0_14, %c0_15], %19 {strides = array<i32>} : memref<1x128x1xf32, #tpu.memory_space<vmem>>, vector<1x128x1xf32>,
    return
  }
  func.func @transform_0(%arg0: i32, %arg1: i32) -> (i32, i32, i32) {
    %c0_i32 = arith.constant 0 : i32
    %c0_i32_0 = arith.constant 0 : i32
    return %arg0, %c0_i32, %arg1 : i32, i32, i32
  }
  func.func @transform_1(%arg0: i32, %arg1: i32) -> (i32, i32, i32) {
    %c0_i32 = arith.constant 0 : i32
    %c0_i32_0 = arith.constant 0 : i32
    %c0_i32_1 = arith.constant 0 : i32
    return %arg0, %c0_i32, %c0_i32_0 : i32, i32, i32
  }
  func.func @transform_2(%arg0: i32, %arg1: i32) -> (i32, i32, i32) {
    %c0_i32 = arith.constant 0 : i32
    %c0_i32_0 = arith.constant 0 : i32
    %c0_i32_1 = arith.constant 0 : i32
    return %arg0, %c0_i32, %c0_i32_0 : i32, i32, i32
  }
}

module attributes {stable_mosaic.version = 11 : i64} {
  func.func @_apply_kernel(%arg0: i32, %arg1: i32, %arg2: memref<1x128x256xf32, #tpu.memory_space<vmem>>, %arg3: memref<128x128xf32, #tpu.memory_space<vmem>>, %arg4: memref<128x1xf32, #tpu.memory_space<vmem>>, %arg5: memref<1x128x256xf32, #tpu.memory_space<vmem>>) attributes {dimension_semantics = [#tpu.dimension_semantics<parallel>, #tpu.dimension_semantics<parallel>], iteration_bounds = array<i64: 2, 1>, scalar_prefetch = 0 : i64, scratch_operands = 0 : i64, tpu.core_type = #tpu.core_type<tc>, window_params = [{transform_indices = @transform_0, window_bounds = array<i64: 1, 128, 256>}, {pipeline_mode = #tpu.pipeline_mode<synchronous>, transform_indices = @transform_1, window_bounds = array<i64: 128, 128>}, {pipeline_mode = #tpu.pipeline_mode<synchronous>, transform_indices = @transform_2, window_bounds = array<i64: 128, 1>}, {transform_indices = @transform_3, window_bounds = array<i64: 1, 128, 256>}]} {
    %c0 = arith.constant 0 : index
    %c0_0 = arith.constant 0 : index
    %c0_1 = arith.constant 0 : index
    %0 = vector.load %arg2[%c0, %c0_0, %c0_1] : memref<1x128x256xf32, #tpu.memory_space<vmem>>, vector<1x128x256xf32>
    %1 = vector.shape_cast %0 : vector<1x128x256xf32> to vector<128x256xf32>
    %c0_2 = arith.constant 0 : index
    %c0_3 = arith.constant 0 : index
    %2 = vector.load %arg3[%c0_2, %c0_3] : memref<128x128xf32, #tpu.memory_space<vmem>>, vector<128x128xf32>
    %cst = arith.constant dense<0.000000e+00> : vector<128x256xf32>
    %3 = tpu.matmul %2, %1, %cst {dimension_numbers = #tpu.dot_dimension_numbers<[1], [0], [0], [1], [0, 0, 1, 1], [], []>} : vector<128x128xf32>, vector<128x256xf32>, vector<128x256xf32> -> vector<128x256xf32>
    %c0_4 = arith.constant 0 : index
    %c0_5 = arith.constant 0 : index
    %4 = vector.load %arg4[%c0_4, %c0_5] : memref<128x1xf32, #tpu.memory_space<vmem>>, vector<128x1xf32>
    %5 = vector.broadcast %4 : vector<128x1xf32> to vector<128x256xf32>
    %6 = arith.addf %3, %5 : vector<128x256xf32>
    %cst_6 = arith.constant 0.000000e+00 : f32
    %7 = vector.broadcast %cst_6 : f32 to vector<128x256xf32>
    %8 = arith.maximumf %6, %7 : vector<128x256xf32>
    %9 = arith.addf %8, %1 : vector<128x256xf32>
    %c0_7 = arith.constant 0 : index
    %c0_8 = arith.constant 0 : index
    %c0_9 = arith.constant 0 : index
    %10 = vector.load %arg5[%c0_7, %c0_8, %c0_9] : memref<1x128x256xf32, #tpu.memory_space<vmem>>, vector<1x128x256xf32>
    %11 = vector.shape_cast %10 : vector<1x128x256xf32> to vector<128x256xf32>
    %12 = vector.shape_cast %9 : vector<128x256xf32> to vector<1x128x256xf32>
    tpu.vector_store %arg5[%c0_7, %c0_8, %c0_9], %12 {strides = array<i32>} : memref<1x128x256xf32, #tpu.memory_space<vmem>>, vector<1x128x256xf32>,
    return
  }
  func.func @transform_0(%arg0: i32, %arg1: i32) -> (i32, i32, i32) {
    %c0_i32 = arith.constant 0 : i32
    %c0_i32_0 = arith.constant 0 : i32
    return %arg0, %c0_i32, %arg1 : i32, i32, i32
  }
  func.func @transform_1(%arg0: i32, %arg1: i32) -> (i32, i32) {
    %c0_i32 = arith.constant 0 : i32
    %c0_i32_0 = arith.constant 0 : i32
    %c0_i32_1 = arith.constant 0 : i32
    return %c0_i32, %c0_i32_0 : i32, i32
  }
  func.func @transform_2(%arg0: i32, %arg1: i32) -> (i32, i32) {
    %c0_i32 = arith.constant 0 : i32
    %c0_i32_0 = arith.constant 0 : i32
    %c0_i32_1 = arith.constant 0 : i32
    return %c0_i32, %c0_i32_0 : i32, i32
  }
  func.func @transform_3(%arg0: i32, %arg1: i32) -> (i32, i32, i32) {
    %c0_i32 = arith.constant 0 : i32
    %c0_i32_0 = arith.constant 0 : i32
    return %arg0, %c0_i32, %arg1 : i32, i32, i32
  }
}

</mosaic_0001>

<bundles_post_ra>
// kernel: sub.11
= control target key start
LH: loop header
LB: loop body
LE: loop exit
PB: predicated region body
PF: predicated region fallthrough
CT: control target
= control target key end

     0   :  { %s34_s0 = inlined_call_operand.vmem [shape: f32[128,1], index: 0, kind: input, shape index: {}]   ;;  %s35_s1 = inlined_call_operand.vmem [shape: f32[128,1], index: 1, kind: input, shape index: {}]   ;;  %s36_s2 = inlined_call_operand.vmem [shape: f32[128,1], index: 2, kind: output, shape index: {}]  }
   0x1   :  { %v3_v0 = vld [vmem:[%s34_s0] sm:$0x1] }
   0x2   :  { %v4_v1 = vld [vmem:[%s35_s1] sm:$0x1] }
   0x3   :  { %v7_v2 = vsub.f32 %v3_v0, %v4_v1 }
   0x5   :  { %9 = vst [vmem:[%s36_s2] sm:$0x1] %v7_v2 }

// kernel: gtnet_resblock.2
= control target key start
LH: loop header
LB: loop body
LE: loop exit
PB: predicated region body
PF: predicated region fallthrough
CT: control target
= control target key end

     0   :  { %s759_s9 = smov 0   ;;  %s761_s10 = smov 0   ;;  %s1117_s0 = inlined_call_operand.vmem [shape: f32[2,128,256], index: 0, kind: input, shape index: {}]   ;;  %s1118_s1 = inlined_call_operand.vmem [shape: f32[2,128,128], index: 1, kind: output, shape index: {0}]   ;;  %s1119_s2 = inlined_call_operand.vmem [shape: f32[2,128,1], index: 2, kind: output, shape index: {1}]  }
   0x1   :  { %s763_s11 = smov 0  }
   0x2 LB: > { %s25_s12 = sadd.s32 1, %s737_s10  ;;  %p650_p0 = scmp.ge.s32.totalorder %s741_s11, 1  ;;  %s741_s11 = sphi %s763_s11, %s13_s11   ;;  %s737_s10 = sphi %s761_s10, %s1121_s10   ;;  %s733_s9 = sphi %s759_s9, %s1120_s9  }
   0x3   : > { %p27_p1 = scmp.ge.s32.totalorder %s25_s12, 2  ;;  %p134_p2 = scmp.lt.s32.totalorder %s741_s11, 3 }
   0x5   : > { %s1123_s12 = smov (%p27_p1, %s25_s12), 0  ;;  %p135_p3 = pnand %p650_p0, %p134_p2 }
   0x6   : > { %p166_p4 = scmp.lt.s32.totalorder (!%p135_p3), %s733_s9, 1 }
   0x7   : > { %138 = sbr.rel (%p135_p3) target bundleno = 303 (0x12f), region = 24 }
   0xc   : > { %s1125_s9 = smov (!%p166_p4, %s733_s9), 1  ;;  %vm205_vm0 = vcmask 7168   ;;  %v743_v3 = vmov 0.0  }
   0xd   : > { %s659_s13 = sshll.u32 %s1125_s9, 8  ;;  %s660_s14 = sshll.u32 %s1125_s9, 7 }
   0xe   : > { %s784_s17 = scalar_lea.vmem %s1117_s0, %s659_s13  ;;  %s791_s20 = scalar_lea.vmem %s1119_s2, %s660_s14 }
   0xf   : > { %v794_v0 = vld [vmem:[%s784_s17 + $0xf8] sm:$0xff]  ;;  %v797_v1 = vld [vmem:[%s784_s17 + $0xf0] sm:$0xff]  ;;  %v800_v2 = vld [vmem:[%s784_s17 + $0xe8] sm:$0xff]  ;;  %208 = vst.msk [vmem:[%s791_s20 + $0x10] sm:$0xff] %vm205_vm0, %v743_v3  ;;  %s1090_s23 = scalar_lea.vmem %s1118_s1, %s660_s14 }
  0x10   : > { %270 = vmatprep.subr.mxu0 %v794_v0  ;;  %662 = vmatprep.subr.mxu1 %v794_v0  ;;  %206 = vst.msk [vmem:[%s791_s20] sm:$0xff] %vm205_vm0, %v743_v3  ;;  %207 = vst.msk [vmem:[%s791_s20 + $0x8] sm:$0xff] %vm205_vm0, %v743_v3  ;;  %v841_v4 = vld [vmem:[%s784_s17 + $0xe0] sm:$0xff]  ;;  %v844_v5 = vld [vmem:[%s784_s17 + $0xd8] sm:$0xff]  ;;  %v508_v47 = vadd.f32 %v794_v0, %v797_v1 }
  0x11   : > { %209 = vst.msk [vmem:[%s791_s20 + $0x18] sm:$0xff] %vm205_vm0, %v743_v3  ;;  %210 = vst.msk [vmem:[%s791_s20 + $0x20] sm:$0xff] %vm205_vm0, %v743_v3  ;;  %271 = vmatpush1.xpose.msra.mxu0 %v797_v1  ;;  %678 = vmatpush1.xpose.msra.mxu1 %v797_v1  ;;  %v847_v6 = vld [vmem:[%s784_s17 + $0x88] sm:$0xff]  ;;  %v855_v7 = vld [vmem:[%s784_s17 + $0xd0] sm:$0xff]  ;;  %v505_v48 = vadd.f32 %v800_v2, %v841_v4 }
  0x12   : > { %211 = vst.msk [vmem:[%s791_s20 + $0x28] sm:$0xff] %vm205_vm0, %v743_v3  ;;  %212 = vst.msk [vmem:[%s791_s20 + $0x30] sm:$0xff] %vm205_vm0, %v743_v3  ;;  %272 = vmatprep.subr.mxu0 %v800_v2  ;;  %663 = vmatprep.subr.mxu1 %v800_v2  ;;  %v858_v8 = vld [vmem:[%s784_s17 + $0xc8] sm:$0xff]  ;;  %v864_v10 = vld [vmem:[%s784_s17 + $0x20] sm:$0xff]  ;;  %v502_v45 = vadd.f32 %v844_v5, %v855_v7 }
  0x13   : > { %213 = vst.msk [vmem:[%s791_s20 + $0x38] sm:$0xff] %vm205_vm0, %v743_v3  ;;  %214 = vst.msk [vmem:[%s791_s20 + $0x40] sm:$0xff] %vm205_vm0, %v743_v3  ;;  %374 = vmatprep.mubr.f32.mxu1 %v847_v6  ;;  %v861_v9 = vld [vmem:[%s784_s17 + $0x28] sm:$0xff]  ;;  %v872_v12 = vld [vmem:[%s784_s17] sm:$0xff] }
  0x14   : > { %215 = vst.msk [vmem:[%s791_s20 + $0x48] sm:$0xff] %vm205_vm0, %v743_v3  ;;  %216 = vst.msk [vmem:[%s791_s20 + $0x50] sm:$0xff] %vm205_vm0, %v743_v3  ;;  %v869_v11 = vld [vmem:[%s784_s17 + $0x8] sm:$0xff]  ;;  %v469_v13 = vadd.f32 %v861_v9, %v864_v10  ;;  %v879_v14 = vld [vmem:[%s784_s17 + $0xc0] sm:$0xff] }
  0x15   : > { %217 = vst.msk [vmem:[%s791_s20 + $0x58] sm:$0xff] %vm205_vm0, %v743_v3  ;;  %218 = vst.msk [vmem:[%s791_s20 + $0x60] sm:$0xff] %vm205_vm0, %v743_v3  ;;  %273 = vmatpush1.xpose.msra.mxu0 %v841_v4  ;;  %679 = vmatpush1.xpose.msra.mxu1 %v841_v4  ;;  %v882_v15 = vld [vmem:[%s784_s17 + $0x38] sm:$0xff]  ;;  %v885_v16 = vld [vmem:[%s784_s17 + $0x30] sm:$0xff]  ;;  %v463_v17 = vadd.f32 %v869_v11, %v872_v12  ;;  %v499_v46 = vadd.f32 %v858_v8, %v879_v14 }
  0x16   : > { %219 = vst.msk [vmem:[%s791_s20 + $0x68] sm:$0xff] %vm205_vm0, %v743_v3  ;;  %220 = vst.msk [vmem:[%s791_s20 + $0x70] sm:$0xff] %vm205_vm0, %v743_v3  ;;  %274 = vmatprep.subr.mxu0 %v844_v5  ;;  %664 = vmatprep.subr.mxu1 %v844_v5  ;;  %v890_v18 = vld [vmem:[%s784_s17 + $0xb8] sm:$0xff]  ;;  %v896_v20 = vld [vmem:[%s784_s17 + $0x10] sm:$0xff]  ;;  %v472_v21 = vadd.f32 %v882_v15, %v885_v16 }
  0x17   : > { %221 = vst.msk [vmem:[%s791_s20 + $0x78] sm:$0xff] %vm205_vm0, %v743_v3  ;;  %v893_v19 = vld [vmem:[%s784_s17 + $0x18] sm:$0xff]  ;;  %334 = vmatprep.mubr.f32.mxu0 %v869_v11  ;;  %470 = vadd.xlane.f32.xlu1 %v469_v13  ;;  %v908_v23 = vld [vmem:[%s784_s17 + $0xb0] sm:$0xff]  ;;  %v917_v26 = vld [vmem:[%s784_s17 + $0xa8] sm:$0xff] }
  0x18   : > { %464 = vadd.xlane.f32.xlu0 %v463_v17  ;;  %v466_v22 = vadd.f32 %v893_v19, %v896_v20  ;;  %v911_v24 = vld [vmem:[%s784_s17 + $0x58] sm:$0xff]  ;;  %v914_v25 = vld [vmem:[%s784_s17 + $0x50] sm:$0xff]  ;;  %v920_v27 = vld [vmem:[%s784_s17 + $0x48] sm:$0xff]  ;;  %v496_v43 = vadd.f32 %v890_v18, %v908_v23 }
  0x19   : > { %275 = vmatpush1.xpose.msra.mxu0 %v855_v7  ;;  %680 = vmatpush1.xpose.msra.mxu1 %v855_v7  ;;  %v923_v28 = vld [vmem:[%s784_s17 + $0x40] sm:$0xff]  ;;  %v478_v29 = vadd.f32 %v911_v24, %v914_v25  ;;  %v937_v32 = vld [vmem:[%s784_s17 + $0x78] sm:$0xff]  ;;  %v940_v33 = vld [vmem:[%s784_s17 + $0x70] sm:$0xff] }
  0x1a   : > { %276 = vmatprep.subr.mxu0 %v858_v8  ;;  %665 = vmatprep.subr.mxu1 %v858_v8  ;;  %v475_v30 = vadd.f32 %v920_v27, %v923_v28  ;;  %v934_v31 = vld [vmem:[%s784_s17 + $0xa0] sm:$0xff]  ;;  %v943_v34 = vld [vmem:[%s784_s17 + $0x98] sm:$0xff]  ;;  %v946_v35 = vld [vmem:[%s784_s17 + $0x68] sm:$0xff]  ;;  %v484_v37 = vadd.f32 %v937_v32, %v940_v33 }
  0x1b   : > { %473 = vadd.xlane.f32.xlu1 %v472_v21  ;;  %v949_v36 = vld [vmem:[%s784_s17 + $0x60] sm:$0xff]  ;;  %v240_v39 = vld [vmem:[%s784_s17 + $0x90] sm:$0xff]  ;;  %v493_v44 = vadd.f32 %v917_v26, %v934_v31  ;;  %v450_v55 = vld [vmem:[%s791_s20 + $0x18] sm:$0xff] }
  0x1c   : > { %467 = vadd.xlane.f32.xlu0 %v466_v22  ;;  %v481_v38 = vadd.f32 %v946_v35, %v949_v36  ;;  %v238_v40 = vld [vmem:[%s784_s17 + $0x80] sm:$0xff]  ;;  %v490_v41 = vadd.f32 %v943_v34, %v240_v39  ;;  %v449_v49 = vld [vmem:[%s791_s20 + $0x10] sm:$0xff]  ;;  %v448_v56 = vld [vmem:[%s791_s20 + $0x8] sm:$0xff] }
  0x1d   : > { %277 = vmatpush1.xpose.msra.mxu0 %v879_v14  ;;  %681 = vmatpush1.xpose.msra.mxu1 %v879_v14  ;;  %v487_v42 = vadd.f32 %v847_v6, %v238_v40  ;;  %v447_v50 = vld [vmem:[%s791_s20] sm:$0xff]  ;;  %v452_v61 = vld [vmem:[%s791_s20 + $0x28] sm:$0xff]  ;;  %v454_v3 = vld [vmem:[%s791_s20 + $0x38] sm:$0xff] }
  0x1e   : > { %278 = vmatprep.subr.mxu0 %v890_v18  ;;  %666 = vmatprep.subr.mxu1 %v890_v18  ;;  %v451_v62 = vld [vmem:[%s791_s20 + $0x20] sm:$0xff]  ;;  %v460_v21 = vld [vmem:[%s791_s20 + $0x68] sm:$0xff] }
  0x1f   : > { %479 = vadd.xlane.f32.xlu1 %v478_v29  ;;  %v459_v22 = vld [vmem:[%s791_s20 + $0x60] sm:$0xff] }
  0x20   : > { %476 = vadd.xlane.f32.xlu0 %v475_v30 }
  0x21   : > { %279 = vmatpush1.xpose.msra.mxu0 %v908_v23  ;;  %682 = vmatpush1.xpose.msra.mxu1 %v908_v23 }
  0x22   : > { %280 = vmatprep.subr.mxu0 %v917_v26  ;;  %667 = vmatprep.subr.mxu1 %v917_v26 }
  0x23   : > { %485 = vadd.xlane.f32.xlu1 %v484_v37 }
  0x24   : > { %482 = vadd.xlane.f32.xlu0 %v481_v38 }
  0x25   : > { %281 = vmatpush1.xpose.msra.mxu0 %v934_v31  ;;  %683 = vmatpush1.xpose.msra.mxu1 %v934_v31 }
  0x26   : > { %282 = vmatprep.subr.mxu0 %v943_v34  ;;  %668 = vmatprep.subr.mxu1 %v943_v34 }
  0x27   : > { %491 = vadd.xlane.f32.xlu1 %v490_v41 }
  0x28   : > { %488 = vadd.xlane.f32.xlu0 %v487_v42 }
  0x29   : > { %283 = vmatpush1.xpose.msra.mxu0 %v240_v39  ;;  %684 = vmatpush1.xpose.msra.mxu1 %v240_v39 }
  0x2a   : > { %284 = vmatprep.subr.mxu0 %v847_v6  ;;  %669 = vmatprep.subr.mxu1 %v847_v6 }
  0x2b   : > { %497 = vadd.xlane.f32.xlu1 %v496_v43 }
  0x2c   : > { %494 = vadd.xlane.f32.xlu0 %v493_v44 }
  0x2d   : > { %285 = vmatpush1.xpose.msra.mxu0 %v238_v40  ;;  %685 = vmatpush1.xpose.msra.mxu1 %v238_v40 }
  0x2e   : > { %286 = vmatprep.subr.mxu0 %v937_v32  ;;  %670 = vmatprep.subr.mxu1 %v937_v32 }
  0x2f   : > { %503 = vadd.xlane.f32.xlu1 %v502_v45 }
  0x30   : > { %500 = vadd.xlane.f32.xlu0 %v499_v46 }
  0x31   : > { %287 = vmatpush1.xpose.msra.mxu0 %v940_v33  ;;  %686 = vmatpush1.xpose.msra.mxu1 %v940_v33 }
  0x32   : > { %288 = vmatprep.subr.mxu0 %v946_v35  ;;  %671 = vmatprep.subr.mxu1 %v946_v35 }
  0x33   : > { %509 = vadd.xlane.f32.xlu1 %v508_v47 }
  0x34   : > { %506 = vadd.xlane.f32.xlu0 %v505_v48 }
  0x35   : > { %289 = vmatpush1.xpose.msra.mxu0 %v949_v36  ;;  %687 = vmatpush1.xpose.msra.mxu1 %v949_v36 }
  0x36   : > { %290 = vmatprep.subr.mxu0 %v911_v24  ;;  %672 = vmatprep.subr.mxu1 %v911_v24 }
  0x39   : > { %291 = vmatpush1.xpose.msra.mxu0 %v914_v25  ;;  %688 = vmatpush1.xpose.msra.mxu1 %v914_v25 }
  0x3a   : > { %292 = vmatprep.subr.mxu0 %v920_v27  ;;  %673 = vmatprep.subr.mxu1 %v920_v27 }
  0x3d   : > { %293 = vmatpush1.xpose.msra.mxu0 %v923_v28  ;;  %689 = vmatpush1.xpose.msra.mxu1 %v923_v28 }
  0x3e   : > { %294 = vmatprep.subr.mxu0 %v882_v15  ;;  %674 = vmatprep.subr.mxu1 %v882_v15 }
  0x41   : > { %295 = vmatpush1.xpose.msra.mxu0 %v885_v16  ;;  %690 = vmatpush1.xpose.msra.mxu1 %v885_v16 }
  0x42   : > { %296 = vmatprep.subr.mxu0 %v861_v9  ;;  %675 = vmatprep.subr.mxu1 %v861_v9 }
  0x45   : > { %297 = vmatpush1.xpose.msra.mxu0 %v864_v10  ;;  %691 = vmatpush1.xpose.msra.mxu1 %v864_v10 }
  0x46   : > { %298 = vmatprep.subr.mxu0 %v893_v19  ;;  %676 = vmatprep.subr.mxu1 %v893_v19 }
  0x49   : > { %299 = vmatpush1.xpose.msra.mxu0 %v896_v20  ;;  %692 = vmatpush1.xpose.msra.mxu1 %v896_v20 }
  0x4a   : > { %300 = vmatprep.subr.mxu0 %v869_v11  ;;  %677 = vmatprep.subr.mxu1 %v869_v11 }
  0x4d   : > { %301 = vmatpush1.xpose.msra.mxu0 %v872_v12  ;;  %693 = vmatpush1.xpose.msra.mxu1 %v872_v12 }
  0x50   : > { %335 = vmatmul.mubr.f32.vlgmr.msra.gmra.mxu0 %v872_v12  ;;  %375 = vmatmul.mubr.f32.vlgmr.msra.gmra.mxu1 %v238_v40 }
  0x51   : > { %339 = vmatprep.mubr.f32.mxu0 %v893_v19  ;;  %379 = vmatprep.mubr.f32.mxu1 %v943_v34 }
  0x54   : > { %340 = vmatmul.mubr.f32.gmra.mxu0 %v896_v20  ;;  %380 = vmatmul.mubr.f32.gmra.mxu1 %v240_v39 }
  0x55   : > { %344 = vmatprep.mubr.f32.mxu0 %v861_v9  ;;  %384 = vmatprep.mubr.f32.mxu1 %v917_v26  ;;  %v456_v9 = vld [vmem:[%s791_s20 + $0x48] sm:$0xff] }
  0x58   : > { %345 = vmatmul.mubr.f32.gmra.mxu0 %v864_v10  ;;  %385 = vmatmul.mubr.f32.gmra.mxu1 %v934_v31  ;;  %v455_v10 = vld [vmem:[%s791_s20 + $0x40] sm:$0xff] }
  0x59   : > { %349 = vmatprep.mubr.f32.mxu0 %v882_v15  ;;  %389 = vmatprep.mubr.f32.mxu1 %v890_v18  ;;  %v458_v15 = vld [vmem:[%s791_s20 + $0x58] sm:$0xff] }
  0x5c   : > { %350 = vmatmul.mubr.f32.gmra.mxu0 %v885_v16  ;;  %390 = vmatmul.mubr.f32.gmra.mxu1 %v908_v23  ;;  %v457_v16 = vld [vmem:[%s791_s20 + $0x50] sm:$0xff] }
  0x5d   : > { %354 = vmatprep.mubr.f32.mxu0 %v920_v27  ;;  %394 = vmatprep.mubr.f32.mxu1 %v858_v8  ;;  %v462_v27 = vld [vmem:[%s791_s20 + $0x78] sm:$0xff] }
  0x60   : > { %355 = vmatmul.mubr.f32.gmra.mxu0 %v923_v28  ;;  %395 = vmatmul.mubr.f32.gmra.mxu1 %v879_v14  ;;  %v461_v28 = vld [vmem:[%s791_s20 + $0x70] sm:$0xff] }
  0x61   : > { %359 = vmatprep.mubr.f32.mxu0 %v911_v24  ;;  %399 = vmatprep.mubr.f32.mxu1 %v844_v5 }
  0x64   : > { %360 = vmatmul.mubr.f32.gmra.mxu0 %v914_v25  ;;  %400 = vmatmul.mubr.f32.gmra.mxu1 %v855_v7 }
  0x65   : > { %364 = vmatprep.mubr.f32.mxu0 %v946_v35  ;;  %404 = vmatprep.mubr.f32.mxu1 %v800_v2 }
  0x68   : > { %365 = vmatmul.mubr.f32.gmra.mxu0 %v949_v36  ;;  %405 = vmatmul.mubr.f32.gmra.mxu1 %v841_v4  ;;  %v453_v4 = vld [vmem:[%s791_s20 + $0x30] sm:$0xff] }
  0x69   : > { %369 = vmatprep.mubr.f32.mxu0 %v937_v32  ;;  %409 = vmatprep.mubr.f32.mxu1 %v794_v0 }
  0x6c   : > { %370 = vmatmul.mubr.f32.gmra.mxu0 %v940_v33  ;;  %410 = vmatmul.mubr.f32.gmra.mxu1 %v797_v1 }
  0xa0   : > { %v471_v51 = vpop.xlane.xlu1 %470 }
  0xa1   : > { %v513_v52 = vadd.f32 %v471_v51, %v449_v49  ;;  %v465_v53 = vpop.xlane.xlu0 %464 }
  0xa2   : > { %v511_v54 = vadd.f32 %v465_v53, %v447_v50 }
  0xa3   : > { %530 = vst.msk [vmem:[%s791_s20 + $0x10] sm:$0xff] %vm205_vm0, %v513_v52 }
  0xa4   : > { %528 = vst.msk [vmem:[%s791_s20] sm:$0xff] %vm205_vm0, %v511_v54  ;;  %v474_v57 = vpop.xlane.xlu1 %473 }
  0xa5   : > { %v514_v58 = vadd.f32 %v474_v57, %v450_v55  ;;  %v468_v59 = vpop.xlane.xlu0 %467 }
  0xa6   : > { %v512_v60 = vadd.f32 %v468_v59, %v448_v56 }
  0xa7   : > { %531 = vst.msk [vmem:[%s791_s20 + $0x18] sm:$0xff] %vm205_vm0, %v514_v58 }
  0xa8   : > { %529 = vst.msk [vmem:[%s791_s20 + $0x8] sm:$0xff] %vm205_vm0, %v512_v60  ;;  %v480_v63 = vpop.xlane.xlu1 %479 }
  0xa9   : > { %v516_v0 = vadd.f32 %v480_v63, %v452_v61  ;;  %v477_v1 = vpop.xlane.xlu0 %476 }
  0xaa   : > { %v515_v2 = vadd.f32 %v477_v1, %v451_v62 }
  0xab   : > { %533 = vst.msk [vmem:[%s791_s20 + $0x28] sm:$0xff] %vm205_vm0, %v516_v0 }
  0xac   : > { %532 = vst.msk [vmem:[%s791_s20 + $0x20] sm:$0xff] %vm205_vm0, %v515_v2  ;;  %v486_v5 = vpop.xlane.xlu1 %485 }
  0xad   : > { %v518_v6 = vadd.f32 %v486_v5, %v454_v3  ;;  %v483_v7 = vpop.xlane.xlu0 %482 }
  0xae   : > { %v517_v8 = vadd.f32 %v483_v7, %v453_v4 }
  0xaf   : > { %535 = vst.msk [vmem:[%s791_s20 + $0x38] sm:$0xff] %vm205_vm0, %v518_v6 }
  0xb0   : > { %534 = vst.msk [vmem:[%s791_s20 + $0x30] sm:$0xff] %vm205_vm0, %v517_v8  ;;  %v492_v11 = vpop.xlane.xlu1 %491 }
  0xb1   : > { %v520_v12 = vadd.f32 %v492_v11, %v456_v9  ;;  %v489_v13 = vpop.xlane.xlu0 %488 }
  0xb2   : > { %v519_v14 = vadd.f32 %v489_v13, %v455_v10 }
  0xb3   : > { %537 = vst.msk [vmem:[%s791_s20 + $0x48] sm:$0xff] %vm205_vm0, %v520_v12 }
  0xb4   : > { %536 = vst.msk [vmem:[%s791_s20 + $0x40] sm:$0xff] %vm205_vm0, %v519_v14  ;;  %v498_v17 = vpop.xlane.xlu1 %497 }
  0xb5   : > { %v522_v18 = vadd.f32 %v498_v17, %v458_v15  ;;  %v495_v19 = vpop.xlane.xlu0 %494 }
  0xb6   : > { %v521_v20 = vadd.f32 %v495_v19, %v457_v16 }
  0xb7   : > { %539 = vst.msk [vmem:[%s791_s20 + $0x58] sm:$0xff] %vm205_vm0, %v522_v18 }
  0xb8   : > { %538 = vst.msk [vmem:[%s791_s20 + $0x50] sm:$0xff] %vm205_vm0, %v521_v20  ;;  %v504_v23 = vpop.xlane.xlu1 %503 }
  0xb9   : > { %v524_v24 = vadd.f32 %v504_v23, %v460_v21  ;;  %v501_v25 = vpop.xlane.xlu0 %500 }
  0xba   : > { %v523_v26 = vadd.f32 %v501_v25, %v459_v22 }
  0xbb   : > { %541 = vst.msk [vmem:[%s791_s20 + $0x68] sm:$0xff] %vm205_vm0, %v524_v24 }
  0xbc   : > { %540 = vst.msk [vmem:[%s791_s20 + $0x60] sm:$0xff] %vm205_vm0, %v523_v26  ;;  %v510_v29 = vpop.xlane.xlu1 %509 }
  0xbd   : > { %v526_v30 = vadd.f32 %v510_v29, %v462_v27  ;;  %v507_v31 = vpop.xlane.xlu0 %506 }
  0xbe   : > { %v525_v32 = vadd.f32 %v507_v31, %v461_v28 }
  0xbf   : > { %543 = vst.msk [vmem:[%s791_s20 + $0x78] sm:$0xff] %vm205_vm0, %v526_v30 }
  0xc0   : > { %542 = vst.msk [vmem:[%s791_s20 + $0x70] sm:$0xff] %vm205_vm0, %v525_v32 }
 0x110   : > { %v336_v33 = vpop.f32.mrf.mxu0  ;;  %v376_v34 = vpop.f32.mrf.mxu1 }
 0x111   : > { %431 = vst [vmem:[%s1090_s23] sm:$0xff] %v336_v33  ;;  %439 = vst [vmem:[%s1090_s23 + $0x40] sm:$0xff] %v376_v34 }
 0x112   : > { %v338_v35 = vpop.f32.mrf.mxu0  ;;  %v378_v36 = vpop.f32.mrf.mxu1 }
 0x114   : > { %v341_v37 = vpop.f32.mrf.mxu0  ;;  %v381_v38 = vpop.f32.mrf.mxu1 }
 0x115   : > { %432 = vst [vmem:[%s1090_s23 + $0x8] sm:$0xff] %v341_v37  ;;  %440 = vst [vmem:[%s1090_s23 + $0x48] sm:$0xff] %v381_v38 }
 0x116   : > { %v343_v39 = vpop.f32.mrf.mxu0  ;;  %v383_v40 = vpop.f32.mrf.mxu1 }
 0x118   : > { %v346_v41 = vpop.f32.mrf.mxu0  ;;  %v386_v42 = vpop.f32.mrf.mxu1 }
 0x119   : > { %433 = vst [vmem:[%s1090_s23 + $0x10] sm:$0xff] %v346_v41  ;;  %441 = vst [vmem:[%s1090_s23 + $0x50] sm:$0xff] %v386_v42 }
 0x11a   : > { %v348_v43 = vpop.f32.mrf.mxu0  ;;  %v388_v44 = vpop.f32.mrf.mxu1 }
 0x11c   : > { %v351_v45 = vpop.f32.mrf.mxu0  ;;  %v391_v46 = vpop.f32.mrf.mxu1 }
 0x11d   : > { %434 = vst [vmem:[%s1090_s23 + $0x18] sm:$0xff] %v351_v45  ;;  %442 = vst [vmem:[%s1090_s23 + $0x58] sm:$0xff] %v391_v46 }
 0x11e   : > { %v353_v47 = vpop.f32.mrf.mxu0  ;;  %v393_v48 = vpop.f32.mrf.mxu1 }
 0x120   : > { %v356_v49 = vpop.f32.mrf.mxu0  ;;  %v396_v50 = vpop.f32.mrf.mxu1 }
 0x121   : > { %435 = vst [vmem:[%s1090_s23 + $0x20] sm:$0xff] %v356_v49  ;;  %443 = vst [vmem:[%s1090_s23 + $0x60] sm:$0xff] %v396_v50 }
 0x122   : > { %v358_v51 = vpop.f32.mrf.mxu0  ;;  %v398_v52 = vpop.f32.mrf.mxu1 }
 0x124   : > { %v361_v53 = vpop.f32.mrf.mxu0  ;;  %v401_v54 = vpop.f32.mrf.mxu1 }
 0x125   : > { %436 = vst [vmem:[%s1090_s23 + $0x28] sm:$0xff] %v361_v53  ;;  %444 = vst [vmem:[%s1090_s23 + $0x68] sm:$0xff] %v401_v54 }
 0x126   : > { %v363_v55 = vpop.f32.mrf.mxu0  ;;  %v403_v56 = vpop.f32.mrf.mxu1 }
 0x128   : > { %v366_v57 = vpop.f32.mrf.mxu0  ;;  %v406_v58 = vpop.f32.mrf.mxu1 }
 0x129   : > { %437 = vst [vmem:[%s1090_s23 + $0x30] sm:$0xff] %v366_v57  ;;  %445 = vst [vmem:[%s1090_s23 + $0x70] sm:$0xff] %v406_v58 }
 0x12a   : > { %v368_v59 = vpop.f32.mrf.mxu0  ;;  %v408_v60 = vpop.f32.mrf.mxu1 }
 0x12c   : > { %v371_v61 = vpop.f32.mrf.mxu0  ;;  %v411_v62 = vpop.f32.mrf.mxu1 }
 0x12d   : > { %438 = vst [vmem:[%s1090_s23 + $0x38] sm:$0xff] %v371_v61  ;;  %446 = vst [vmem:[%s1090_s23 + $0x78] sm:$0xff] %v411_v62 }
 0x12e   : > { %v373_v63 = vpop.f32.mrf.mxu0  ;;  %v413_v0 = vpop.f32.mrf.mxu1 }
 0x12f PF: > { %s13_s11 = sadd.s32 1, %s741_s11   ;;  %s1120_s9 = smov %s737_s10 }
 0x130   : > { %p10_p5 = scmp.ge.s32.totalorder %s13_s11, 4   ;;  %s1121_s10 = smov %s1123_s12 }
 0x132   :  { %12 = sbr.rel (!%p10_p5) target bundleno = 2 (0x2), region = 70 }

// kernel: gtnet_resblock.3
= control target key start
LH: loop header
LB: loop body
LE: loop exit
PB: predicated region body
PF: predicated region fallthrough
CT: control target
= control target key end

     0   :  { %s817_s12 = smov 0   ;;  %s819_s13 = smov 0   ;;  %s1217_s0 = inlined_call_operand.vmem [shape: f32[2,128,256], index: 0, kind: input, shape index: {}]   ;;  %s1218_s1 = inlined_call_operand.vmem [shape: f32[128,128], index: 1, kind: input, shape index: {}]   ;;  %s1219_s2 = inlined_call_operand.vmem [shape: f32[128,1], index: 2, kind: input, shape index: {}]   ;;  %s1220_s3 = inlined_call_operand.vmem [shape: f32[2,128,256], index: 3, kind: output, shape index: {}]  }
   0x1   :  { %s821_s14 = smov 0  }
   0x2 LB: > { %s25_s15 = sadd.s32 1, %s789_s13  ;;  %p702_p0 = scmp.ge.s32.totalorder %s793_s14, 1  ;;  %s793_s14 = sphi %s821_s14, %s13_s14   ;;  %s789_s13 = sphi %s819_s13, %s1222_s13   ;;  %s785_s12 = sphi %s817_s12, %s1221_s12  }
   0x3   : > { %p27_p1 = scmp.ge.s32.totalorder %s25_s15, 2  ;;  %p158_p2 = scmp.lt.s32.totalorder %s793_s14, 3 }
   0x5   : > { %s1224_s15 = smov (%p27_p1, %s25_s15), 0  ;;  %p159_p3 = pnand %p702_p0, %p158_p2 }
   0x6   : > { %p191_p4 = scmp.lt.s32.totalorder (!%p159_p3), %s785_s12, 1 }
   0x7   : > { %162 = sbr.rel (%p159_p3) target bundleno = 279 (0x117), region = 32 }
   0xc   : > { %v795_v0 = vmov 0.0   ;;  %s1226_s12 = smov (!%p191_p4, %s785_s12), 1  ;;  %v796_v1 = vmov 0   ;;  %v260_v2 = vld [vmem:[%s1219_s2 + $0x10] sm:$0xff]  ;;  %v258_v3 = vld [vmem:[%s1219_s2] sm:$0xff]  ;;  %v261_v38 = vld [vmem:[%s1219_s2 + $0x18] sm:$0xff] }
   0xd   : > { %418 = vmatprep.mubr.f32.mxu0 %v795_v0  ;;  %466 = vmatprep.mubr.f32.mxu1 %v795_v0  ;;  %s709_s16 = sshll.u32 %s1226_s12, 8  ;;  %v242_v36 = vld [vmem:[%s1218_s1] sm:$0xff]  ;;  %v259_v39 = vld [vmem:[%s1219_s2 + $0x8] sm:$0xff]  ;;  %v244_v44 = vld [vmem:[%s1218_s1 + $0x10] sm:$0xff] }
   0xe   : > { %770 = vset.pattern.permute.xlu1 %v796_v1  ;;  %769 = vset.pattern.permute.xlu0 %v796_v1  ;;  %s845_s19 = scalar_lea.vmem %s1217_s0, %s709_s16  ;;  %v250_v37 = vld [vmem:[%s1218_s1 + $0x40] sm:$0xff]  ;;  %v243_v40 = vld [vmem:[%s1218_s1 + $0x8] sm:$0xff]  ;;  %v252_v45 = vld [vmem:[%s1218_s1 + $0x50] sm:$0xff]  ;;  %s1132_s20 = scalar_lea.vmem %s1220_s3, %s709_s16 }
   0xf   : > { %v854_v4 = vld [vmem:[%s845_s19 + $0xf8] sm:$0xff]  ;;  %v857_v5 = vld [vmem:[%s845_s19 + $0xf0] sm:$0xff]  ;;  %v860_v6 = vld [vmem:[%s845_s19 + $0xe8] sm:$0xff]  ;;  %286 = vperm.xlu1 %770, %v260_v2   ;;  %276 = vperm.xlu0 %769, %v258_v3  }
  0x10   : > { %354 = vmatprep.subr.mxu0 %v854_v4  ;;  %711 = vmatprep.subr.mxu1 %v854_v4  ;;  %v865_v7 = vld [vmem:[%s845_s19 + $0xe0] sm:$0xff]  ;;  %v870_v8 = vld [vmem:[%s845_s19 + $0xd8] sm:$0xff]  ;;  %v875_v9 = vld [vmem:[%s845_s19 + $0xd0] sm:$0xff] }
  0x11   : > { %355 = vmatpush1.msra.mxu0 %v857_v5  ;;  %727 = vmatpush1.msra.mxu1 %v857_v5  ;;  %v880_v10 = vld [vmem:[%s845_s19 + $0xc8] sm:$0xff]  ;;  %v885_v11 = vld [vmem:[%s845_s19 + $0xc0] sm:$0xff]  ;;  %v890_v12 = vld [vmem:[%s845_s19 + $0xb8] sm:$0xff] }
  0x12   : > { %356 = vmatprep.subr.mxu0 %v860_v6  ;;  %712 = vmatprep.subr.mxu1 %v860_v6  ;;  %v895_v13 = vld [vmem:[%s845_s19 + $0xb0] sm:$0xff]  ;;  %v900_v14 = vld [vmem:[%s845_s19 + $0xa8] sm:$0xff]  ;;  %v905_v15 = vld [vmem:[%s845_s19 + $0xa0] sm:$0xff] }
  0x13   : > { %357 = vmatpush1.msra.mxu0 %v865_v7  ;;  %728 = vmatpush1.msra.mxu1 %v865_v7  ;;  %v910_v16 = vld [vmem:[%s845_s19 + $0x98] sm:$0xff]  ;;  %v915_v17 = vld [vmem:[%s845_s19 + $0x90] sm:$0xff]  ;;  %v920_v18 = vld [vmem:[%s845_s19 + $0x88] sm:$0xff] }
  0x14   : > { %358 = vmatprep.subr.mxu0 %v870_v8  ;;  %713 = vmatprep.subr.mxu1 %v870_v8  ;;  %v925_v19 = vld [vmem:[%s845_s19 + $0x80] sm:$0xff]  ;;  %v930_v20 = vld [vmem:[%s845_s19 + $0x78] sm:$0xff]  ;;  %v935_v21 = vld [vmem:[%s845_s19 + $0x70] sm:$0xff] }
  0x15   : > { %359 = vmatpush1.msra.mxu0 %v875_v9  ;;  %729 = vmatpush1.msra.mxu1 %v875_v9  ;;  %v940_v22 = vld [vmem:[%s845_s19 + $0x68] sm:$0xff]  ;;  %v945_v23 = vld [vmem:[%s845_s19 + $0x60] sm:$0xff]  ;;  %v950_v24 = vld [vmem:[%s845_s19 + $0x58] sm:$0xff] }
  0x16   : > { %360 = vmatprep.subr.mxu0 %v880_v10  ;;  %714 = vmatprep.subr.mxu1 %v880_v10  ;;  %v955_v25 = vld [vmem:[%s845_s19 + $0x50] sm:$0xff]  ;;  %v960_v26 = vld [vmem:[%s845_s19 + $0x48] sm:$0xff]  ;;  %v965_v27 = vld [vmem:[%s845_s19 + $0x40] sm:$0xff] }
  0x17   : > { %361 = vmatpush1.msra.mxu0 %v885_v11  ;;  %730 = vmatpush1.msra.mxu1 %v885_v11  ;;  %v970_v28 = vld [vmem:[%s845_s19 + $0x38] sm:$0xff]  ;;  %v975_v29 = vld [vmem:[%s845_s19 + $0x30] sm:$0xff]  ;;  %v980_v30 = vld [vmem:[%s845_s19 + $0x28] sm:$0xff] }
  0x18   : > { %362 = vmatprep.subr.mxu0 %v890_v12  ;;  %715 = vmatprep.subr.mxu1 %v890_v12  ;;  %v985_v31 = vld [vmem:[%s845_s19 + $0x20] sm:$0xff]  ;;  %v990_v32 = vld [vmem:[%s845_s19 + $0x18] sm:$0xff]  ;;  %v995_v33 = vld [vmem:[%s845_s19 + $0x10] sm:$0xff] }
  0x19   : > { %363 = vmatpush1.msra.mxu0 %v895_v13  ;;  %731 = vmatpush1.msra.mxu1 %v895_v13  ;;  %v1000_v34 = vld [vmem:[%s845_s19 + $0x8] sm:$0xff]  ;;  %v1005_v35 = vld [vmem:[%s845_s19] sm:$0xff]  ;;  %v265_v46 = vld [vmem:[%s1219_s2 + $0x38] sm:$0xff] }
  0x1a   : > { %364 = vmatprep.subr.mxu0 %v900_v14  ;;  %716 = vmatprep.subr.mxu1 %v900_v14  ;;  %v251_v41 = vld [vmem:[%s1218_s1 + $0x48] sm:$0xff]  ;;  %v262_v43 = vld [vmem:[%s1219_s2 + $0x20] sm:$0xff]  ;;  %v264_v47 = vld [vmem:[%s1219_s2 + $0x30] sm:$0xff] }
  0x1b   : > { %365 = vmatpush1.msra.mxu0 %v905_v15  ;;  %732 = vmatpush1.msra.mxu1 %v905_v15  ;;  %v263_v42 = vld [vmem:[%s1219_s2 + $0x28] sm:$0xff]  ;;  %v245_v48 = vld [vmem:[%s1218_s1 + $0x18] sm:$0xff]  ;;  %v266_v51 = vld [vmem:[%s1219_s2 + $0x40] sm:$0xff] }
  0x1c   : > { %366 = vmatprep.subr.mxu0 %v910_v16  ;;  %717 = vmatprep.subr.mxu1 %v910_v16  ;;  %v253_v49 = vld [vmem:[%s1218_s1 + $0x58] sm:$0xff]  ;;  %v267_v50 = vld [vmem:[%s1219_s2 + $0x48] sm:$0xff]  ;;  %v246_v52 = vld [vmem:[%s1218_s1 + $0x20] sm:$0xff] }
  0x1d   : > { %367 = vmatpush1.msra.mxu0 %v915_v17  ;;  %733 = vmatpush1.msra.mxu1 %v915_v17  ;;  %v254_v53 = vld [vmem:[%s1218_s1 + $0x60] sm:$0xff]  ;;  %v269_v54 = vld [vmem:[%s1219_s2 + $0x58] sm:$0xff]  ;;  %v268_v55 = vld [vmem:[%s1219_s2 + $0x50] sm:$0xff] }
  0x1e   : > { %368 = vmatprep.subr.mxu0 %v920_v18  ;;  %718 = vmatprep.subr.mxu1 %v920_v18  ;;  %v247_v56 = vld [vmem:[%s1218_s1 + $0x28] sm:$0xff]  ;;  %v270_v59 = vld [vmem:[%s1219_s2 + $0x60] sm:$0xff]  ;;  %v248_v60 = vld [vmem:[%s1218_s1 + $0x30] sm:$0xff] }
  0x1f   : > { %369 = vmatpush1.msra.mxu0 %v925_v19  ;;  %734 = vmatpush1.msra.mxu1 %v925_v19  ;;  %v255_v57 = vld [vmem:[%s1218_s1 + $0x68] sm:$0xff]  ;;  %v256_v61 = vld [vmem:[%s1218_s1 + $0x70] sm:$0xff]  ;;  %v273_v62 = vld [vmem:[%s1219_s2 + $0x78] sm:$0xff] }
  0x20   : > { %370 = vmatprep.subr.mxu0 %v930_v20  ;;  %719 = vmatprep.subr.mxu1 %v930_v20  ;;  %v271_v58 = vld [vmem:[%s1219_s2 + $0x68] sm:$0xff]  ;;  %v272_v63 = vld [vmem:[%s1219_s2 + $0x70] sm:$0xff]  ;;  %v249_v1 = vld [vmem:[%s1218_s1 + $0x38] sm:$0xff] }
  0x21   : > { %371 = vmatpush1.msra.mxu0 %v935_v21  ;;  %735 = vmatpush1.msra.mxu1 %v935_v21  ;;  %v257_v2 = vld [vmem:[%s1218_s1 + $0x78] sm:$0xff] }
  0x22   : > { %372 = vmatprep.subr.mxu0 %v940_v22  ;;  %720 = vmatprep.subr.mxu1 %v940_v22 }
  0x23   : > { %373 = vmatpush1.msra.mxu0 %v945_v23  ;;  %736 = vmatpush1.msra.mxu1 %v945_v23 }
  0x24   : > { %374 = vmatprep.subr.mxu0 %v950_v24  ;;  %721 = vmatprep.subr.mxu1 %v950_v24 }
  0x25   : > { %375 = vmatpush1.msra.mxu0 %v955_v25  ;;  %737 = vmatpush1.msra.mxu1 %v955_v25 }
  0x26   : > { %376 = vmatprep.subr.mxu0 %v960_v26  ;;  %722 = vmatprep.subr.mxu1 %v960_v26 }
  0x27   : > { %377 = vmatpush1.msra.mxu0 %v965_v27  ;;  %738 = vmatpush1.msra.mxu1 %v965_v27 }
  0x28   : > { %378 = vmatprep.subr.mxu0 %v970_v28  ;;  %723 = vmatprep.subr.mxu1 %v970_v28 }
  0x29   : > { %379 = vmatpush1.msra.mxu0 %v975_v29  ;;  %739 = vmatpush1.msra.mxu1 %v975_v29 }
  0x2a   : > { %380 = vmatprep.subr.mxu0 %v980_v30  ;;  %724 = vmatprep.subr.mxu1 %v980_v30 }
  0x2b   : > { %381 = vmatpush1.msra.mxu0 %v985_v31  ;;  %740 = vmatpush1.msra.mxu1 %v985_v31 }
  0x2c   : > { %382 = vmatprep.subr.mxu0 %v990_v32  ;;  %725 = vmatprep.subr.mxu1 %v990_v32 }
  0x2d   : > { %383 = vmatpush1.msra.mxu0 %v995_v33  ;;  %741 = vmatpush1.msra.mxu1 %v995_v33 }
  0x2e   : > { %384 = vmatprep.subr.mxu0 %v1000_v34  ;;  %726 = vmatprep.subr.mxu1 %v1000_v34 }
  0x2f   : > { %385 = vmatpush1.msra.mxu0 %v1005_v35  ;;  %742 = vmatpush1.msra.mxu1 %v1005_v35 }
  0x30   : > { %419 = vmatmul.mubr.f32.vlgmr.msra.gmra.mxu0 %v242_v36  ;;  %467 = vmatmul.mubr.f32.vlgmr.msra.gmra.mxu1 %v250_v37 }
  0x31   : > { %424 = vmatprep.mubr.f32.mxu0 %v795_v0  ;;  %472 = vmatprep.mubr.f32.mxu1 %v795_v0 }
  0x32   : > { %291 = vperm.xlu1 %770, %v261_v38   ;;  %281 = vperm.xlu0 %769, %v259_v39  }
  0x34   : > { %425 = vmatmul.mubr.f32.gmra.mxu0 %v243_v40  ;;  %473 = vmatmul.mubr.f32.gmra.mxu1 %v251_v41 }
  0x35   : > { %430 = vmatprep.mubr.f32.mxu0 %v795_v0  ;;  %478 = vmatprep.mubr.f32.mxu1 %v795_v0 }
  0x36   : > { %301 = vperm.xlu1 %770, %v263_v42   ;;  %296 = vperm.xlu0 %769, %v262_v43  }
  0x38   : > { %431 = vmatmul.mubr.f32.gmra.mxu0 %v244_v44  ;;  %479 = vmatmul.mubr.f32.gmra.mxu1 %v252_v45 }
  0x39   : > { %436 = vmatprep.mubr.f32.mxu0 %v795_v0  ;;  %484 = vmatprep.mubr.f32.mxu1 %v795_v0 }
  0x3a   : > { %311 = vperm.xlu1 %770, %v265_v46   ;;  %306 = vperm.xlu0 %769, %v264_v47  }
  0x3c   : > { %437 = vmatmul.mubr.f32.gmra.mxu0 %v245_v48  ;;  %485 = vmatmul.mubr.f32.gmra.mxu1 %v253_v49 }
  0x3d   : > { %442 = vmatprep.mubr.f32.mxu0 %v795_v0  ;;  %490 = vmatprep.mubr.f32.mxu1 %v795_v0 }
  0x3e   : > { %321 = vperm.xlu1 %770, %v267_v50   ;;  %316 = vperm.xlu0 %769, %v266_v51  }
  0x40   : > { %443 = vmatmul.mubr.f32.gmra.mxu0 %v246_v52  ;;  %491 = vmatmul.mubr.f32.gmra.mxu1 %v254_v53 }
  0x41   : > { %448 = vmatprep.mubr.f32.mxu0 %v795_v0  ;;  %496 = vmatprep.mubr.f32.mxu1 %v795_v0 }
  0x42   : > { %331 = vperm.xlu1 %770, %v269_v54   ;;  %326 = vperm.xlu0 %769, %v268_v55  }
  0x44   : > { %449 = vmatmul.mubr.f32.gmra.mxu0 %v247_v56  ;;  %497 = vmatmul.mubr.f32.gmra.mxu1 %v255_v57 }
  0x45   : > { %454 = vmatprep.mubr.f32.mxu0 %v795_v0  ;;  %502 = vmatprep.mubr.f32.mxu1 %v795_v0 }
  0x46   : > { %341 = vperm.xlu1 %770, %v271_v58   ;;  %336 = vperm.xlu0 %769, %v270_v59  }
  0x48   : > { %455 = vmatmul.mubr.f32.gmra.mxu0 %v248_v60  ;;  %503 = vmatmul.mubr.f32.gmra.mxu1 %v256_v61 }
  0x49   : > { %460 = vmatprep.mubr.f32.mxu0 %v795_v0  ;;  %508 = vmatprep.mubr.f32.mxu1 %v795_v0 }
  0x4a   : > { %351 = vperm.xlu1 %770, %v273_v62   ;;  %346 = vperm.xlu0 %769, %v272_v63  }
  0x4c   : > { %461 = vmatmul.mubr.f32.gmra.mxu0 %v249_v1  ;;  %509 = vmatmul.mubr.f32.gmra.mxu1 %v257_v2 }
  0x8a   : > { %v277_v3 = vpop.permute.xlu0 %276  ;;  %v287_v36 = vpop.permute.xlu1 %286 }
  0xad   : > { %v282_v37 = vpop.permute.xlu0 %281  ;;  %v1117_v38 = vpop.permute.xlu1 %291 }
  0xb1   : > { %v1119_v39 = vpop.permute.xlu0 %296  ;;  %v1121_v0 = vpop.permute.xlu1 %301 }
  0xb5   : > { %v1123_v40 = vpop.permute.xlu0 %306  ;;  %v1125_v41 = vpop.permute.xlu1 %311 }
  0xb9   : > { %v317_v42 = vpop.permute.xlu0 %316  ;;  %v322_v55 = vpop.permute.xlu1 %321 }
  0xbd   : > { %v327_v1 = vpop.permute.xlu0 %326 }
  0xf0   : > { %v420_v43 = vpop.f32.mrf.mxu0  ;;  %v468_v44 = vpop.f32.mrf.mxu1 }
  0xf1   : > { %v421_v45 = vadd.f32 %v420_v43, %v277_v3  ;;  %v469_v46 = vadd.f32 %v468_v44, %v317_v42 }
  0xf2   : > { %v422_v47 = vpop.f32.mrf.mxu0  ;;  %v470_v48 = vpop.f32.mrf.mxu1 }
  0xf3   : > { %v515_v49 = vmax.f32 %v421_v45, 0.0  ;;  %v531_v50 = vmax.f32 %v469_v46, 0.0  ;;  %v423_v51 = vadd.f32 %v422_v47, %v277_v3  ;;  %v471_v52 = vadd.f32 %v470_v48, %v317_v42 }
  0xf4   : > { %v426_v53 = vpop.f32.mrf.mxu0  ;;  %v474_v54 = vpop.f32.mrf.mxu1 }
  0xf5   : > { %v547_v56 = vadd.f32 %v515_v49, %v1005_v35  ;;  %v563_v57 = vadd.f32 %v531_v50, %v925_v19  ;;  %v516_v58 = vmax.f32 %v423_v51, 0.0  ;;  %v532_v59 = vmax.f32 %v471_v52, 0.0  ;;  %v332_v51 = vpop.permute.xlu1 %331 }
  0xf6   : > { %v427_v60 = vadd.f32 %v426_v53, %v282_v37  ;;  %v475_v61 = vadd.f32 %v474_v54, %v322_v55  ;;  %v428_v62 = vpop.f32.mrf.mxu0  ;;  %v476_v63 = vpop.f32.mrf.mxu1 }
  0xf7   : > { %579 = vst [vmem:[%s1132_s20] sm:$0xff] %v547_v56  ;;  %595 = vst [vmem:[%s1132_s20 + $0x80] sm:$0xff] %v563_v57  ;;  %v548_v2 = vadd.f32 %v516_v58, %v1000_v34  ;;  %v564_v3 = vadd.f32 %v532_v59, %v920_v18  ;;  %v429_v42 = vadd.f32 %v428_v62, %v282_v37 }
  0xf8   : > { %v477_v43 = vadd.f32 %v476_v63, %v322_v55  ;;  %v517_v35 = vmax.f32 %v427_v60, 0.0  ;;  %v533_v44 = vmax.f32 %v475_v61, 0.0  ;;  %v432_v19 = vpop.f32.mrf.mxu0  ;;  %v480_v45 = vpop.f32.mrf.mxu1 }
  0xf9   : > { %580 = vst [vmem:[%s1132_s20 + $0x8] sm:$0xff] %v548_v2  ;;  %596 = vst [vmem:[%s1132_s20 + $0x88] sm:$0xff] %v564_v3  ;;  %v518_v46 = vmax.f32 %v429_v42, 0.0  ;;  %v433_v48 = vadd.f32 %v432_v19, %v287_v36  ;;  %v481_v49 = vadd.f32 %v480_v45, %v327_v1 }
  0xfa   : > { %v534_v47 = vmax.f32 %v477_v43, 0.0  ;;  %v549_v50 = vadd.f32 %v517_v35, %v995_v33  ;;  %v565_v18 = vadd.f32 %v533_v44, %v915_v17  ;;  %v434_v34 = vpop.f32.mrf.mxu0  ;;  %v482_v37 = vpop.f32.mrf.mxu1 }
  0xfb   : > { %v550_v52 = vadd.f32 %v518_v46, %v990_v32  ;;  %v519_v54 = vmax.f32 %v433_v48, 0.0  ;;  %v535_v55 = vmax.f32 %v481_v49, 0.0  ;;  %v435_v56 = vadd.f32 %v434_v34, %v287_v36  ;;  %v337_v35 = vpop.permute.xlu0 %336 }
  0xfc   : > { %v566_v53 = vadd.f32 %v534_v47, %v910_v16  ;;  %581 = vst [vmem:[%s1132_s20 + $0x10] sm:$0xff] %v549_v50  ;;  %597 = vst [vmem:[%s1132_s20 + $0x90] sm:$0xff] %v565_v18  ;;  %v483_v57 = vadd.f32 %v482_v37, %v327_v1  ;;  %v438_v58 = vpop.f32.mrf.mxu0  ;;  %v486_v33 = vpop.f32.mrf.mxu1 }
  0xfd   : > { %582 = vst [vmem:[%s1132_s20 + $0x18] sm:$0xff] %v550_v52  ;;  %v551_v17 = vadd.f32 %v519_v54, %v985_v31  ;;  %v567_v59 = vadd.f32 %v535_v55, %v905_v15  ;;  %v439_v32 = vadd.f32 %v438_v58, %v1117_v38  ;;  %v487_v60 = vadd.f32 %v486_v33, %v332_v51 }
  0xfe   : > { %598 = vst [vmem:[%s1132_s20 + $0x98] sm:$0xff] %v566_v53  ;;  %v520_v16 = vmax.f32 %v435_v56, 0.0  ;;  %v536_v61 = vmax.f32 %v483_v57, 0.0  ;;  %v440_v62 = vpop.f32.mrf.mxu0  ;;  %v488_v63 = vpop.f32.mrf.mxu1 }
  0xff   : > { %583 = vst [vmem:[%s1132_s20 + $0x20] sm:$0xff] %v551_v17  ;;  %599 = vst [vmem:[%s1132_s20 + $0xa0] sm:$0xff] %v567_v59  ;;  %v521_v36 = vmax.f32 %v439_v32, 0.0  ;;  %v537_v1 = vmax.f32 %v487_v60, 0.0  ;;  %v441_v2 = vadd.f32 %v440_v62, %v1117_v38  ;;  %v489_v3 = vadd.f32 %v488_v63, %v332_v51  ;;  %v347_v57 = vpop.permute.xlu0 %346 }
 0x100   : > { %v552_v31 = vadd.f32 %v520_v16, %v980_v30  ;;  %v568_v15 = vadd.f32 %v536_v61, %v900_v14  ;;  %v444_v42 = vpop.f32.mrf.mxu0  ;;  %v492_v43 = vpop.f32.mrf.mxu1 }
 0x101   : > { %v553_v44 = vadd.f32 %v521_v36, %v975_v29  ;;  %v569_v19 = vadd.f32 %v537_v1, %v895_v13  ;;  %v522_v45 = vmax.f32 %v441_v2, 0.0  ;;  %v538_v46 = vmax.f32 %v489_v3, 0.0  ;;  %v342_v14 = vpop.permute.xlu1 %341 }
 0x102   : > { %584 = vst [vmem:[%s1132_s20 + $0x28] sm:$0xff] %v552_v31  ;;  %600 = vst [vmem:[%s1132_s20 + $0xa8] sm:$0xff] %v568_v15  ;;  %v445_v38 = vadd.f32 %v444_v42, %v1119_v39  ;;  %v493_v30 = vadd.f32 %v492_v43, %v337_v35  ;;  %v446_v47 = vpop.f32.mrf.mxu0  ;;  %v494_v48 = vpop.f32.mrf.mxu1 }
 0x103   : > { %585 = vst [vmem:[%s1132_s20 + $0x30] sm:$0xff] %v553_v44  ;;  %601 = vst [vmem:[%s1132_s20 + $0xb0] sm:$0xff] %v569_v19  ;;  %v554_v49 = vadd.f32 %v522_v45, %v970_v28  ;;  %v570_v29 = vadd.f32 %v538_v46, %v890_v12  ;;  %v447_v13 = vadd.f32 %v446_v47, %v1119_v39 }
 0x104   : > { %v495_v50 = vadd.f32 %v494_v48, %v337_v35  ;;  %v523_v18 = vmax.f32 %v445_v38, 0.0  ;;  %v539_v34 = vmax.f32 %v493_v30, 0.0  ;;  %v450_v37 = vpop.f32.mrf.mxu0  ;;  %v498_v51 = vpop.f32.mrf.mxu1 }
 0x105   : > { %586 = vst [vmem:[%s1132_s20 + $0x38] sm:$0xff] %v554_v49  ;;  %602 = vst [vmem:[%s1132_s20 + $0xb8] sm:$0xff] %v570_v29  ;;  %v524_v52 = vmax.f32 %v447_v13, 0.0  ;;  %v451_v54 = vadd.f32 %v450_v37, %v1121_v0  ;;  %v499_v55 = vadd.f32 %v498_v51, %v342_v14  ;;  %v352_v43 = vpop.permute.xlu1 %351 }
 0x106   : > { %v540_v53 = vmax.f32 %v495_v50, 0.0  ;;  %v555_v28 = vadd.f32 %v523_v18, %v965_v27  ;;  %v571_v12 = vadd.f32 %v539_v34, %v885_v11  ;;  %v452_v39 = vpop.f32.mrf.mxu0  ;;  %v500_v56 = vpop.f32.mrf.mxu1 }
 0x107   : > { %v556_v58 = vadd.f32 %v524_v52, %v960_v26  ;;  %v525_v17 = vmax.f32 %v451_v54, 0.0  ;;  %v541_v59 = vmax.f32 %v499_v55, 0.0  ;;  %v453_v32 = vadd.f32 %v452_v39, %v1121_v0 }
 0x108   : > { %v572_v33 = vadd.f32 %v540_v53, %v880_v10  ;;  %587 = vst [vmem:[%s1132_s20 + $0x40] sm:$0xff] %v555_v28  ;;  %603 = vst [vmem:[%s1132_s20 + $0xc0] sm:$0xff] %v571_v12  ;;  %v501_v60 = vadd.f32 %v500_v56, %v342_v14  ;;  %v456_v27 = vpop.f32.mrf.mxu0  ;;  %v504_v16 = vpop.f32.mrf.mxu1 }
 0x109   : > { %588 = vst [vmem:[%s1132_s20 + $0x48] sm:$0xff] %v556_v58  ;;  %v557_v11 = vadd.f32 %v525_v17, %v955_v25  ;;  %v573_v61 = vadd.f32 %v541_v59, %v875_v9  ;;  %v457_v26 = vadd.f32 %v456_v27, %v1123_v40  ;;  %v505_v10 = vadd.f32 %v504_v16, %v347_v57 }
 0x10a   : > { %604 = vst [vmem:[%s1132_s20 + $0xc8] sm:$0xff] %v572_v33  ;;  %v526_v62 = vmax.f32 %v453_v32, 0.0  ;;  %v542_v63 = vmax.f32 %v501_v60, 0.0  ;;  %v458_v36 = vpop.f32.mrf.mxu0  ;;  %v506_v1 = vpop.f32.mrf.mxu1 }
 0x10b   : > { %589 = vst [vmem:[%s1132_s20 + $0x50] sm:$0xff] %v557_v11  ;;  %605 = vst [vmem:[%s1132_s20 + $0xd0] sm:$0xff] %v573_v61  ;;  %v527_v0 = vmax.f32 %v457_v26, 0.0  ;;  %v543_v2 = vmax.f32 %v505_v10, 0.0  ;;  %v459_v3 = vadd.f32 %v458_v36, %v1123_v40  ;;  %v507_v31 = vadd.f32 %v506_v1, %v347_v57 }
 0x10c   : > { %v558_v25 = vadd.f32 %v526_v62, %v950_v24  ;;  %v574_v9 = vadd.f32 %v542_v63, %v870_v8  ;;  %v462_v15 = vpop.f32.mrf.mxu0  ;;  %v510_v42 = vpop.f32.mrf.mxu1 }
 0x10d   : > { %v559_v35 = vadd.f32 %v527_v0, %v945_v23  ;;  %v575_v44 = vadd.f32 %v543_v2, %v865_v7  ;;  %v528_v19 = vmax.f32 %v459_v3, 0.0  ;;  %v544_v45 = vmax.f32 %v507_v31, 0.0 }
 0x10e   : > { %590 = vst [vmem:[%s1132_s20 + $0x58] sm:$0xff] %v558_v25  ;;  %606 = vst [vmem:[%s1132_s20 + $0xd8] sm:$0xff] %v574_v9  ;;  %v463_v40 = vadd.f32 %v462_v15, %v1125_v41  ;;  %v511_v46 = vadd.f32 %v510_v42, %v352_v43  ;;  %v464_v24 = vpop.f32.mrf.mxu0  ;;  %v512_v38 = vpop.f32.mrf.mxu1 }
 0x10f   : > { %591 = vst [vmem:[%s1132_s20 + $0x60] sm:$0xff] %v559_v35  ;;  %607 = vst [vmem:[%s1132_s20 + $0xe0] sm:$0xff] %v575_v44  ;;  %v560_v8 = vadd.f32 %v528_v19, %v940_v22  ;;  %v576_v7 = vadd.f32 %v544_v45, %v860_v6  ;;  %v465_v23 = vadd.f32 %v464_v24, %v1125_v41 }
 0x110   : > { %v513_v30 = vadd.f32 %v512_v38, %v352_v43  ;;  %v529_v47 = vmax.f32 %v463_v40, 0.0  ;;  %v545_v48 = vmax.f32 %v511_v46, 0.0 }
 0x111   : > { %592 = vst [vmem:[%s1132_s20 + $0x68] sm:$0xff] %v560_v8  ;;  %608 = vst [vmem:[%s1132_s20 + $0xe8] sm:$0xff] %v576_v7  ;;  %v530_v14 = vmax.f32 %v465_v23, 0.0 }
 0x112   : > { %v546_v49 = vmax.f32 %v513_v30, 0.0  ;;  %v561_v29 = vadd.f32 %v529_v47, %v935_v21  ;;  %v577_v13 = vadd.f32 %v545_v48, %v857_v5 }
 0x113   : > { %v562_v50 = vadd.f32 %v530_v14, %v930_v20 }
 0x114   : > { %v578_v22 = vadd.f32 %v546_v49, %v854_v4  ;;  %593 = vst [vmem:[%s1132_s20 + $0x70] sm:$0xff] %v561_v29  ;;  %609 = vst [vmem:[%s1132_s20 + $0xf0] sm:$0xff] %v577_v13 }
 0x115   : > { %594 = vst [vmem:[%s1132_s20 + $0x78] sm:$0xff] %v562_v50 }
 0x116   : > { %610 = vst [vmem:[%s1132_s20 + $0xf8] sm:$0xff] %v578_v22 }
 0x117 PF: > { %s13_s14 = sadd.s32 1, %s793_s14   ;;  %s1221_s12 = smov %s789_s13 }
 0x118   : > { %p10_p5 = scmp.ge.s32.totalorder %s13_s14, 4   ;;  %s1222_s13 = smov %s1224_s15 }
 0x11a   :  { %12 = sbr.rel (!%p10_p5) target bundleno = 2 (0x2), region = 62 }

</bundles_post_ra>
